<compile_context>
chip_gen: v7x
topology: tpu7x:2x2x1
jax: 0.10.0
libtpu: 0.0.40
codegen_flags: <defaults>
</compile_context>

<pallas_src>
import jax
import jax.numpy as jnp
from jax.experimental import pallas as pl
from jax.experimental.pallas import tpu as pltpu

_LANES = 128
_SUBLANES = 8


def _round_up(v, m):
    return ((v + m - 1) // m) * m


def _linear_kernel(x_ref, w_ref, b_ref, o_ref):
    # x_ref: (TILE_B, E_pad), w_ref: (E_pad, C_pad), b_ref: (1, C_pad)
    # o_ref: (TILE_B, C_pad)
    acc = jnp.dot(x_ref[...], w_ref[...], preferred_element_type=jnp.float32)
    o_ref[...] = (acc + b_ref[...]).astype(o_ref.dtype)


def linear_head_forward(x, weight, bias, *, tile_b=256):
    """x: (B, E); weight: (C, E); bias: (C,) -> (B, C) == x @ W^T + b."""
    B, E = x.shape
    C = weight.shape[0]

    # --- lane-dense padding (glue done in plain JAX, outside the kernel) -----
    C_pad = max(_LANES, _round_up(C, _LANES))
    E_pad = max(_LANES, _round_up(E, _LANES))

    w_t = jnp.zeros((E_pad, C_pad), dtype=weight.dtype).at[:E, :C].set(weight.T)
    b2d = jnp.zeros((1, C_pad), dtype=bias.dtype).at[:, :C].set(bias)

    if E_pad != E:
        x = jnp.pad(x, ((0, 0), (0, E_pad - E)))

    # --- batch tiling: multiple of 8 sublanes, capped for VMEM safety --------
    tile_b = int(min(tile_b, max(_SUBLANES, _round_up(B, _SUBLANES))))
    tile_b = _round_up(tile_b, _SUBLANES)
    B_pad = _round_up(B, tile_b)
    if B_pad != B:
        x = jnp.pad(x, ((0, B_pad - B), (0, 0)))

    grid = (B_pad // tile_b,)

    itemsize = jnp.dtype(x.dtype).itemsize
    cost = pl.CostEstimate(
        flops=2 * B_pad * E_pad * C_pad,
        transcendentals=0,
        bytes_accessed=itemsize * (B_pad * E_pad + E_pad * C_pad + C_pad
                                   + B_pad * C_pad),
    )

    out = pl.pallas_call(
        _linear_kernel,
        out_shape=jax.ShapeDtypeStruct((B_pad, C_pad), x.dtype),
        grid=grid,
        in_specs=[
            pl.BlockSpec((tile_b, E_pad), lambda i: (i, 0)),  # x marches over batch
            pl.BlockSpec((E_pad, C_pad), lambda i: (0, 0)),   # weight resident
            pl.BlockSpec((1, C_pad), lambda i: (0, 0)),       # bias resident
        ],
        out_specs=pl.BlockSpec((tile_b, C_pad), lambda i: (i, 0)),
        compiler_params=pltpu.CompilerParams(
            dimension_semantics=("parallel",)),
        cost_estimate=cost,
    )(x, w_t, b2d)

    return out[:B, :C]


if __name__ == "__main__":
    embedding_size = 384
    num_classes = 10
    batch = 8

    key = jax.random.PRNGKey(0)
    k_x, k_w, k_b = jax.random.split(key, 3)

    # Deterministic parameter init mimicking nn.Linear default
    # (uniform in [-1/sqrt(E), 1/sqrt(E)]).
    bound = 1.0 / (embedding_size ** 0.5)
    weight = jax.random.uniform(k_w, (num_classes, embedding_size),
                                minval=-bound, maxval=bound, dtype=jnp.float32)
    bias = jax.random.uniform(k_b, (num_classes,),
                              minval=-bound, maxval=bound, dtype=jnp.float32)

    x = jax.random.normal(k_x, (batch, embedding_size), dtype=jnp.float32)

    out = linear_head_forward(x, weight, bias)
    out = jax.block_until_ready(out)

    # Reference check in plain JAX.
    ref = x @ weight.T + bias
    assert out.shape == (batch, num_classes)
    assert jnp.allclose(out, ref, atol=1e-5, rtol=1e-5), "mismatch vs reference"

    print("KERNEL_OK")
</pallas_src>

<mosaic_0001>
module attributes {stable_mosaic.version = 11 : i64} {
  func.func @_linear_kernel(%arg0: i32, %arg1: memref<8x384xf32, #tpu.memory_space<vmem>>, %arg2: memref<384x128xf32, #tpu.memory_space<vmem>>, %arg3: memref<1x128xf32, #tpu.memory_space<vmem>>, %arg4: memref<8x128xf32, #tpu.memory_space<vmem>>) attributes {dimension_semantics = [#tpu.dimension_semantics<parallel>], iteration_bounds = array<i64: 1>, scalar_prefetch = 0 : i64, scratch_operands = 0 : i64, tpu.core_type = #tpu.core_type<tc>, window_params = [{transform_indices = @transform_0, window_bounds = array<i64: 8, 384>}, {pipeline_mode = #tpu.pipeline_mode<synchronous>, transform_indices = @transform_1, window_bounds = array<i64: 384, 128>}, {pipeline_mode = #tpu.pipeline_mode<synchronous>, transform_indices = @transform_2, window_bounds = array<i64: 1, 128>}, {transform_indices = @transform_3, window_bounds = array<i64: 8, 128>}]} {
    %c0 = arith.constant 0 : index
    %c0_0 = arith.constant 0 : index
    %0 = vector.load %arg1[%c0, %c0_0] : memref<8x384xf32, #tpu.memory_space<vmem>>, vector<8x384xf32>
    %c0_1 = arith.constant 0 : index
    %c0_2 = arith.constant 0 : index
    %1 = vector.load %arg2[%c0_1, %c0_2] : memref<384x128xf32, #tpu.memory_space<vmem>>, vector<384x128xf32>
    %cst = arith.constant dense<0.000000e+00> : vector<8x128xf32>
    %2 = tpu.matmul %0, %1, %cst {dimension_numbers = #tpu.dot_dimension_numbers<[1], [0], [0], [1], [0, 0, 1, 1], [], []>} : vector<8x384xf32>, vector<384x128xf32>, vector<8x128xf32> -> vector<8x128xf32>
    %c0_3 = arith.constant 0 : index
    %c0_4 = arith.constant 0 : index
    %3 = vector.load %arg3[%c0_3, %c0_4] : memref<1x128xf32, #tpu.memory_space<vmem>>, vector<1x128xf32>
    %4 = vector.broadcast %3 : vector<1x128xf32> to vector<8x128xf32>
    %5 = arith.addf %2, %4 : vector<8x128xf32>
    %c0_5 = arith.constant 0 : index
    %c0_6 = arith.constant 0 : index
    %6 = vector.load %arg4[%c0_5, %c0_6] : memref<8x128xf32, #tpu.memory_space<vmem>>, vector<8x128xf32>
    tpu.vector_store %arg4[%c0_5, %c0_6], %5 {strides = array<i32>} : memref<8x128xf32, #tpu.memory_space<vmem>>, vector<8x128xf32>,
    return
  }
  func.func @transform_0(%arg0: i32) -> (i32, i32) {
    %c0_i32 = arith.constant 0 : i32
    %c0_i32_0 = arith.constant 0 : i32
    return %arg0, %c0_i32 : i32, i32
  }
  func.func @transform_1(%arg0: i32) -> (i32, i32) {
    %c0_i32 = arith.constant 0 : i32
    %c0_i32_0 = arith.constant 0 : i32
    %c0_i32_1 = arith.constant 0 : i32
    return %c0_i32, %c0_i32_0 : i32, i32
  }
  func.func @transform_2(%arg0: i32) -> (i32, i32) {
    %c0_i32 = arith.constant 0 : i32
    %c0_i32_0 = arith.constant 0 : i32
    %c0_i32_1 = arith.constant 0 : i32
    return %c0_i32, %c0_i32_0 : i32, i32
  }
  func.func @transform_3(%arg0: i32) -> (i32, i32) {
    %c0_i32 = arith.constant 0 : i32
    %c0_i32_0 = arith.constant 0 : i32
    return %arg0, %c0_i32 : i32, i32
  }
}

</mosaic_0001>

<bundles_post_ra>
// kernel: tpu_custom_call.1
= control target key start
LH: loop header
LB: loop body
LE: loop exit
PB: predicated region body
PF: predicated region fallthrough
CT: control target
= control target key end

     0   :  { %8 = vsyncpa [#allocation3], 0  ;;  %s562_s0 = inlined_call_operand.hbm [shape: f32[8,384], index: 0, kind: input, shape index: {}]   ;;  %s563_s1 = inlined_call_operand.hbm [shape: f32[384,128], index: 1, kind: input, shape index: {}]   ;;  %s564_s2 = inlined_call_operand.vmem [shape: f32[1,128], index: 2, kind: input, shape index: {}]   ;;  %s565_s3 = inlined_call_operand.hbm [shape: f32[8,128], index: 3, kind: output, shape index: {}]  }
   0x1   :  { %9 = vsyncpa [#allocation6], 0 }
   0x2   :  { %10 = vsyncpa [#allocation4], 0  ;;  %s480_s12 = smov [#allocation2]   ;;  %s481_s14 = smov [#allocation5]  }
   0x3   :  { %s17_s13 = sshll.u32 %s480_s12, 4  ;;  %s26_s15 = sshll.u32 %s481_s14, 4  ;;  %s18_s13 = int_to_ptr.vmem [resolvable:$true] %s17_s13  ;;  %s508_s15 = int_to_ptr.vmem [resolvable:$true] %s26_s15 }
   0x4   :  { %s408_s18 = scalar_lea.hbm %s562_s0, 384 }
   0x5   :  { %p409_p0 = scmp.ne.s32.totalorder %s562_s0, %s408_s18  ;;  %p412_p1 = scmp.lt.u32.totalorder %s408_s18, %s562_s0 }
   0x7   :  { %p414_p2 = pnand %p412_p1, %p409_p0 }
   0x9   :  { %417 = shalt.err (!%p414_p2)
}
   0xa   :  { %s418_s23 = scalar_lea.vmem %s18_s13, 384  ;;  %p423_p4 = scmp.lt.s32.totalorder %s18_s13, %s18_s13 }
   0xb   :  { %p419_p3 = scmp.ne.s32.totalorder %s18_s13, %s418_s23  ;;  %p424_p5 = scmp.lt.s32.totalorder %s418_s23, %s418_s23 }
   0xd   :  { %p425_p6 = por %p424_p5, %p423_p4 }
   0xf   :  { %p426_p7 = pnand %p425_p6, %p419_p3 }
  0x11   :  { %429 = shalt.err (!%p426_p7)
}
  0x12   :  { %20 = dma.hbm_to_vmem [thread:$0]  %s562_s0, 384, %s18_s13, [#allocation3]  }
  0x13   :  { %s430_s28 = scalar_lea.hbm %s563_s1, 6144 }
  0x14   :  { %p431_p8 = scmp.ne.s32.totalorder %s563_s1, %s430_s28  ;;  %p434_p9 = scmp.lt.u32.totalorder %s430_s28, %s563_s1 }
  0x16   :  { %p436_p10 = pnand %p434_p9, %p431_p8 }
  0x18   :  { %439 = shalt.err (!%p436_p10)
}
  0x19   :  { %s440_s6 = scalar_lea.vmem %s508_s15, 6144  ;;  %p445_p12 = scmp.lt.s32.totalorder %s508_s15, %s508_s15 }
  0x1a   :  { %p441_p11 = scmp.ne.s32.totalorder %s508_s15, %s440_s6  ;;  %p446_p13 = scmp.lt.s32.totalorder %s440_s6, %s440_s6 }
  0x1c   :  { %p447_p0 = por %p446_p13, %p445_p12 }
  0x1e   :  { %p448_p1 = pnand %p447_p0, %p441_p11 }
  0x20   :  { %451 = shalt.err (!%p448_p1)
}
  0x21   :  { %s482_s0 = smov 128   ;;  %s483_s7 = smov 8  }
  0x22   :  { %32 = dma.hbm_to_vmem [thread:$0]  %s563_s1, 6144, %s508_s15, [#allocation6], %s482_s0, %s482_s0, %s483_s7  }
  0x23   :  { %474 = dma.done.wait [#allocation3], 384  }
  0x24   :  { %475 = vsyncadd [#allocation3], 4294966912 }
  0x25   :  { %476 = dma.done.wait [#allocation6], 6144  }
  0x26   :  { %477 = vsyncadd [#allocation6], 4294961152  ;;  %v484_v0 = vmov 0.0|0.0   ;;  %vm485_vm0 = vmmov 0   ;;  %v486_v1 = vmov 0.0   ;;  %v60_v2 = vld [vmem:[#allocation5 + $0x80] sm:$0xff] }
  0x27   :  { %376 = vmatprep.subr.bf16.mxu1 %v484_v0  ;;  %341 = vmatprep.mubr.msk.f32.mxu1 %vm485_vm0, %v486_v1  ;;  %v61_v3 = vld [vmem:[#allocation5 + $0x88] sm:$0xff]  ;;  %v44_v4 = vld [vmem:[#allocation5] sm:$0xff]  ;;  %v62_v7 = vld [vmem:[#allocation5 + $0x90] sm:$0xff]  ;;  %s487_s11 = smov [#allocation7]  }
  0x28   :  { %v344_v5 = vpack.c.bf16 %v61_v3, %v60_v2  ;;  %v45_v6 = vld [vmem:[#allocation5 + $0x8] sm:$0xff]  ;;  %v63_v8 = vld [vmem:[#allocation5 + $0x98] sm:$0xff]  ;;  %v46_v11 = vld [vmem:[#allocation5 + $0x10] sm:$0xff]  ;;  %s246_s12 = sshll.u32 %s487_s11, 4  ;;  %s247_s12 = int_to_ptr.vmem [resolvable:$true] %s246_s12 }
  0x29   :  { %v346_v9 = vpack.c.bf16 %v45_v6, %v44_v4  ;;  %v348_v10 = vpack.c.bf16 %v63_v8, %v62_v7  ;;  %v47_v12 = vld [vmem:[#allocation5 + $0x18] sm:$0xff]  ;;  %v76_v13 = vld [vmem:[#allocation5 + $0x100] sm:$0xff]  ;;  %v77_v14 = vld [vmem:[#allocation5 + $0x108] sm:$0xff]  ;;  %s452_s13 = scalar_lea.vmem %s247_s12, 128  ;;  %p457_p3 = scmp.lt.s32.totalorder %s247_s12, %s247_s12 }
  0x2a   :  { %345 = vmatprep.subr.bf16.mxu0 %v344_v5  ;;  %v64_v15 = vld [vmem:[#allocation5 + $0xa0] sm:$0xff]  ;;  %v65_v16 = vld [vmem:[#allocation5 + $0xa8] sm:$0xff]  ;;  %v350_v17 = vpack.c.bf16 %v47_v12, %v46_v11  ;;  %v377_v18 = vpack.c.bf16 %v77_v14, %v76_v13  ;;  %v78_v19 = vld [vmem:[#allocation5 + $0x110] sm:$0xff]  ;;  %p453_p2 = scmp.ne.s32.totalorder %s247_s12, %s452_s13  ;;  %p458_p4 = scmp.lt.s32.totalorder %s452_s13, %s452_s13 }
  0x2b   :  { %347 = vmatpush3.bf16.msra.mxu0 %v346_v9  ;;  %v352_v20 = vpack.c.bf16 %v65_v16, %v64_v15  ;;  %v48_v21 = vld [vmem:[#allocation5 + $0x20] sm:$0xff]  ;;  %v49_v22 = vld [vmem:[#allocation5 + $0x28] sm:$0xff]  ;;  %v79_v23 = vld [vmem:[#allocation5 + $0x118] sm:$0xff] }
  0x2c   :  { %349 = vmatprep.subr.bf16.mxu0 %v348_v10  ;;  %378 = vmatpush3.bf16.msra.mxu1 %v377_v18  ;;  %v380_v24 = vpack.c.bf16 %v79_v23, %v78_v19  ;;  %v66_v25 = vld [vmem:[#allocation5 + $0xb0] sm:$0xff]  ;;  %v67_v26 = vld [vmem:[#allocation5 + $0xb8] sm:$0xff]  ;;  %v80_v27 = vld [vmem:[#allocation5 + $0x120] sm:$0xff]  ;;  %v354_v29 = vpack.c.bf16 %v49_v22, %v48_v21  ;;  %p459_p5 = por %p458_p4, %p457_p3 }
  0x2d   :  { %379 = vmatprep.subr.bf16.mxu1 %v484_v0  ;;  %v81_v28 = vld [vmem:[#allocation5 + $0x128] sm:$0xff]  ;;  %v356_v30 = vpack.c.bf16 %v67_v26, %v66_v25  ;;  %v50_v31 = vld [vmem:[#allocation5 + $0x30] sm:$0xff]  ;;  %v51_v32 = vld [vmem:[#allocation5 + $0x38] sm:$0xff] }
  0x2e   :  { %v383_v33 = vpack.c.bf16 %v81_v28, %v80_v27  ;;  %v68_v34 = vld [vmem:[#allocation5 + $0xc0] sm:$0xff]  ;;  %v69_v35 = vld [vmem:[#allocation5 + $0xc8] sm:$0xff]  ;;  %v82_v36 = vld [vmem:[#allocation5 + $0x130] sm:$0xff]  ;;  %v358_v38 = vpack.c.bf16 %v51_v32, %v50_v31  ;;  %p460_p6 = pnand %p459_p5, %p453_p2 }
  0x2f   :  { %351 = vmatpush3.bf16.msra.mxu0 %v350_v17  ;;  %v83_v37 = vld [vmem:[#allocation5 + $0x138] sm:$0xff]  ;;  %v360_v39 = vpack.c.bf16 %v69_v35, %v68_v34  ;;  %v52_v40 = vld [vmem:[#allocation5 + $0x40] sm:$0xff]  ;;  %v53_v41 = vld [vmem:[#allocation5 + $0x48] sm:$0xff] }
  0x30   :  { %353 = vmatprep.subr.bf16.mxu0 %v352_v20  ;;  %381 = vmatpush3.bf16.msra.mxu1 %v380_v24  ;;  %v386_v42 = vpack.c.bf16 %v83_v37, %v82_v36  ;;  %v70_v43 = vld [vmem:[#allocation5 + $0xd0] sm:$0xff]  ;;  %v71_v44 = vld [vmem:[#allocation5 + $0xd8] sm:$0xff]  ;;  %v84_v45 = vld [vmem:[#allocation5 + $0x140] sm:$0xff]  ;;  %v362_v48 = vpack.c.bf16 %v53_v41, %v52_v40 }
  0x31   :  { %382 = vmatprep.subr.bf16.mxu1 %v484_v0  ;;  %v85_v46 = vld [vmem:[#allocation5 + $0x148] sm:$0xff]  ;;  %v42_v47 = vld [vmem:[#allocation2 + $0x8] sm:$0xff]  ;;  %v364_v49 = vpack.c.bf16 %v71_v44, %v70_v43  ;;  %v55_v51 = vld [vmem:[#allocation5 + $0x58] sm:$0xff] }
  0x32   :  { %163 = vmatprep.mubr.f32.mxu0 %v42_v47  ;;  %v54_v50 = vld [vmem:[#allocation5 + $0x50] sm:$0xff]  ;;  %v389_v52 = vpack.c.bf16 %v85_v46, %v84_v45  ;;  %v72_v53 = vld [vmem:[#allocation5 + $0xe0] sm:$0xff]  ;;  %v73_v54 = vld [vmem:[#allocation5 + $0xe8] sm:$0xff] }
  0x33   :  { %355 = vmatpush3.bf16.msra.mxu0 %v354_v29  ;;  %v86_v55 = vld [vmem:[#allocation5 + $0x150] sm:$0xff]  ;;  %v87_v56 = vld [vmem:[#allocation5 + $0x158] sm:$0xff]  ;;  %v366_v57 = vpack.c.bf16 %v55_v51, %v54_v50  ;;  %v368_v58 = vpack.c.bf16 %v73_v54, %v72_v53  ;;  %v56_v59 = vld [vmem:[#allocation5 + $0x60] sm:$0xff] }
  0x34   :  { %357 = vmatprep.subr.bf16.mxu0 %v356_v30  ;;  %384 = vmatpush3.bf16.msra.mxu1 %v383_v33  ;;  %v57_v60 = vld [vmem:[#allocation5 + $0x68] sm:$0xff]  ;;  %v392_v61 = vpack.c.bf16 %v87_v56, %v86_v55  ;;  %v74_v62 = vld [vmem:[#allocation5 + $0xf0] sm:$0xff]  ;;  %v75_v63 = vld [vmem:[#allocation5 + $0xf8] sm:$0xff] }
  0x35   :  { %385 = vmatprep.subr.bf16.mxu1 %v484_v0  ;;  %v88_v1 = vld [vmem:[#allocation5 + $0x160] sm:$0xff]  ;;  %v89_v2 = vld [vmem:[#allocation5 + $0x168] sm:$0xff]  ;;  %v370_v3 = vpack.c.bf16 %v57_v60, %v56_v59  ;;  %v372_v4 = vpack.c.bf16 %v75_v63, %v74_v62  ;;  %v58_v5 = vld [vmem:[#allocation5 + $0x70] sm:$0xff] }
  0x36   :  { %v59_v6 = vld [vmem:[#allocation5 + $0x78] sm:$0xff]  ;;  %v395_v7 = vpack.c.bf16 %v89_v2, %v88_v1  ;;  %v90_v8 = vld [vmem:[#allocation5 + $0x170] sm:$0xff]  ;;  %v41_v12 = vld [vmem:[#allocation2] sm:$0xff] }
  0x37   :  { %359 = vmatpush3.bf16.msra.mxu0 %v358_v38  ;;  %v91_v9 = vld [vmem:[#allocation5 + $0x178] sm:$0xff]  ;;  %v374_v10 = vpack.c.bf16 %v59_v6, %v58_v5  ;;  %v256_v16 = vld [vmem:[%s564_s2] ss:$0 sm:$0xff] }
  0x38   :  { %361 = vmatprep.subr.bf16.mxu0 %v360_v39  ;;  %387 = vmatpush3.bf16.msra.mxu1 %v386_v42  ;;  %v398_v11 = vpack.c.bf16 %v91_v9, %v90_v8  ;;  %v43_v13 = vld [vmem:[#allocation2 + $0x10] sm:$0xff] }
  0x39   :  { %388 = vmatprep.subr.bf16.mxu1 %v484_v0 }
  0x3b   :  { %363 = vmatpush3.bf16.msra.mxu0 %v362_v48 }
  0x3c   :  { %365 = vmatprep.subr.bf16.mxu0 %v364_v49  ;;  %390 = vmatpush3.bf16.msra.mxu1 %v389_v52 }
  0x3d   :  { %391 = vmatprep.subr.bf16.mxu1 %v484_v0 }
  0x3f   :  { %367 = vmatpush3.bf16.msra.mxu0 %v366_v57 }
  0x40   :  { %369 = vmatprep.subr.bf16.mxu0 %v368_v58  ;;  %393 = vmatpush3.bf16.msra.mxu1 %v392_v61 }
  0x41   :  { %394 = vmatprep.subr.bf16.mxu1 %v484_v0 }
  0x43   :  { %371 = vmatpush3.bf16.msra.mxu0 %v370_v3 }
  0x44   :  { %373 = vmatprep.subr.bf16.mxu0 %v372_v4  ;;  %396 = vmatpush3.bf16.msra.mxu1 %v395_v7 }
  0x45   :  { %397 = vmatprep.subr.bf16.mxu1 %v484_v0 }
  0x47   :  { %375 = vmatpush3.bf16.msra.mxu0 %v374_v10 }
  0x48   :  { %399 = vmatpush3.bf16.msra.mxu1 %v398_v11 }
  0x4a   :  { %164 = vmatmul.mubr.f32.vlgmr.msra.gmra.mrb[0].mxu0 %v41_v12 }
  0x4b   :  { %342 = vmatmul.mubr.f32.vlgmr.msra.gmra.mrb[0].mxu1 %v43_v13 }
 0x11d   :  { %v289_v14 = vpop.f32.mrb[0].mxu0 }
 0x11e   :  { %v290_v15 = vpop.f32.mrb[1].mxu0  ;;  %v235_v18 = vpop.f32.mrb[0].mxu1 }
 0x11f   :  { %v291_v17 = vadd.f32 %v290_v15, %v289_v14  ;;  %v343_v19 = vpop.f32.mrb[1].mxu1 }
 0x121   :  { %v166_v20 = vadd.f32 %v291_v17, %v256_v16 }
 0x123   :  { %v236_v21 = vadd.f32 %v235_v18, %v166_v20 }
 0x125   :  { %239 = vst [vmem:[#allocation7] sm:$0xff] %v236_v21 }
 0x126   :  { %463 = shalt.err (!%p460_p6)
}
 0x127   :  { %s464_s2 = scalar_lea.hbm %s565_s3, 128 }
 0x128   :  { %p465_p7 = scmp.ne.s32.totalorder %s565_s3, %s464_s2  ;;  %p468_p8 = scmp.lt.u32.totalorder %s464_s2, %s565_s3 }
 0x12a   :  { %p470_p9 = pnand %p468_p8, %p465_p7 }
 0x12c   :  { %473 = shalt.err (!%p470_p9)
}
 0x12d   :  { %249 = dma.vmem_to_hbm [thread:$0]  %s247_s12, 128, %s565_s3, [#allocation4]  }
 0x12e   :  { %478 = dma.done.wait [#allocation4], 128  }
 0x12f   :  { %479 = vsyncadd [#allocation4], 4294967168 }
 0x130   :  { %253 = vsyncpa [#allocation3], 1 }
 0x131   :  { %254 = vsyncpa [#allocation6], 1 }
 0x132   :  { %255 = vsyncpa [#allocation4], 1 }

</bundles_post_ra>
